<compile_context>
chip_gen: v6e
topology: v6e:2x2x1
jax: 0.10.0
libtpu: 0.0.40
codegen_flags: <defaults>
</compile_context>

<pallas_src>
import jax
import jax.numpy as jnp
from jax.experimental import pallas as pl
from jax.experimental.pallas import tpu as pltpu


def self_attention_kernel(x_ref, wqkv_ref, bqkv_ref, out_ref, rel_ref):
    B, S, E = x_ref.shape
    H = wqkv_ref.shape[1] // 3

    x = x_ref[...].astype(jnp.float32)            # (B, S, E)
    xf = x.reshape(B * S, E)                      # leading-dim fold: free

    # One fused projection: [phi | theta | g].  w_phi/b_phi are pre-scaled by
    # 1/sqrt(E) in the wrapper, so no separate attention-scale op is needed.
    proj = jnp.dot(xf, wqkv_ref[...],
                   preferred_element_type=jnp.float32) + bqkv_ref[...]
    proj = proj.reshape(B, S, 3 * H)
    phi = proj[:, :, 0 * H:1 * H]
    theta = proj[:, :, 1 * H:2 * H]
    g = proj[:, :, 2 * H:3 * H]

    # rel = relu(phi @ theta^T / sqrt(E)); the 1/sqrt(E) already lives in phi.
    rel = jnp.einsum("bsh,bth->bst", phi, theta,
                     preferred_element_type=jnp.float32)
    rel = jnp.maximum(rel, 0.0)
    # Symmetrize.  relu(A)^T == relu(A^T) == relu(theta @ phi^T): compute the
    # transposed half with a second (idle-MXU) matmul instead of an XLU
    # transpose of the result — no materialized .T anywhere.
    rel_t = jnp.einsum("bsh,bth->bst", theta, phi,
                       preferred_element_type=jnp.float32)
    rel_t = jnp.maximum(rel_t, 0.0)
    rel = (rel + rel_t) * 0.5

    # Row-normalize: reciprocal of the (B,S,1) row-sum + broadcast multiply.
    row_sum = jnp.sum(rel, axis=-1, keepdims=True)
    rel = rel * pl.reciprocal(row_sum + 1e-8, approx=False)

    # Attention output + residual.
    att = jnp.einsum("bst,bth->bsh", rel, g,
                     preferred_element_type=jnp.float32)
    out_ref[...] = (att + x).astype(out_ref.dtype)
    # At production S this store should be lane-dense (or kept VMEM-only);
    # at S=8 the masked store is negligible.
    rel_ref[...] = rel.astype(rel_ref.dtype)


def self_attention(audio_feature, w_phi, b_phi, w_theta, b_theta, w_g, b_g):
    """audio_feature: (B, S, E);  w_*: (E, H);  b_*: (1, H).  Requires H == E."""
    B, S, E = audio_feature.shape
    H = w_phi.shape[1]
    assert H == E, "residual add requires hidden_dim == audio_emb_dim"

    # Fold the 1/sqrt(E) attention scale into the phi projection (exact up to
    # float rounding: relu and symmetrization commute with a positive scale).
    scale = 1.0 / jnp.sqrt(jnp.float32(E))
    w_qkv = jnp.concatenate([w_phi * scale, w_theta, w_g], axis=1)   # (E, 3H)
    b_qkv = jnp.concatenate([b_phi * scale, b_theta, b_g], axis=1)   # (1, 3H)

    out, rel = pl.pallas_call(
        self_attention_kernel,
        out_shape=(
            jax.ShapeDtypeStruct((B, S, E), jnp.float32),
            jax.ShapeDtypeStruct((B, S, S), jnp.float32),
        ),
        grid_spec=pltpu.PrefetchScalarGridSpec(
            num_scalar_prefetch=0,
            grid=(1,),   # single step: per-step overhead >> work at these sizes
            in_specs=[
                pl.BlockSpec((B, S, E), lambda i: (0, 0, 0)),
                pl.BlockSpec((E, 3 * H), lambda i: (0, 0)),
                pl.BlockSpec((1, 3 * H), lambda i: (0, 0)),
            ],
            out_specs=[
                pl.BlockSpec((B, S, E), lambda i: (0, 0, 0)),
                pl.BlockSpec((B, S, S), lambda i: (0, 0, 0)),
            ],
        ),
        compiler_params=pltpu.CompilerParams(
            dimension_semantics=("arbitrary",)),
    )(audio_feature, w_qkv, b_qkv)
    return out, rel


def xavier_uniform(key, fan_in, fan_out):
    # matches torch.nn.init.xavier_uniform_ for an [out, in] weight; we store
    # the transpose [in, out] so the in-kernel math is x @ W.
    bound = jnp.sqrt(6.0 / (fan_in + fan_out))
    return jax.random.uniform(key, (fan_in, fan_out), jnp.float32, -bound, bound)


if __name__ == "__main__":
    # Small shapes: batch=2, seg_num=8, audio_emb_dim=hidden_dim=32.
    B, S, E, H = 2, 8, 32, 32
    key = jax.random.PRNGKey(0)
    kx, kphi, ktheta, kg = jax.random.split(key, 4)

    audio_feature = jax.random.normal(kx, (B, S, E), jnp.float32)

    w_phi = xavier_uniform(kphi, E, H)
    w_theta = xavier_uniform(ktheta, E, H)
    w_g = xavier_uniform(kg, E, H)
    b_phi = jnp.zeros((1, H), jnp.float32)
    b_theta = jnp.zeros((1, H), jnp.float32)
    b_g = jnp.zeros((1, H), jnp.float32)

    out, rel = self_attention(audio_feature, w_phi, b_phi,
                              w_theta, b_theta, w_g, b_g)
    jax.block_until_ready((out, rel))

    # Pure-JAX reference (original, unfused math).
    phi_a = audio_feature @ w_phi + b_phi
    theta_a = audio_feature @ w_theta + b_theta
    g_a = audio_feature @ w_g + b_g
    r = jnp.einsum("bsh,bth->bst", phi_a, theta_a) / jnp.sqrt(jnp.float32(E))
    r = jnp.maximum(r, 0.0)
    r = (r + jnp.transpose(r, (0, 2, 1))) / 2.0
    r = r / (jnp.sum(r, axis=-1, keepdims=True) + 1e-8)
    ref_out = jnp.einsum("bst,bth->bsh", r, g_a) + audio_feature

    assert jnp.allclose(out, ref_out, atol=1e-4, rtol=1e-4), \
        float(jnp.max(jnp.abs(out - ref_out)))
    assert jnp.allclose(rel, r, atol=1e-4, rtol=1e-4), \
        float(jnp.max(jnp.abs(rel - r)))
    print("KERNEL_OK")
</pallas_src>

<mosaic_0001>
module attributes {stable_mosaic.version = 11 : i64} {
  func.func @self_attention_kernel(%arg0: i32, %arg1: memref<2x8x32xf32, #tpu.memory_space<vmem>>, %arg2: memref<32x96xf32, #tpu.memory_space<vmem>>, %arg3: memref<1x96xf32, #tpu.memory_space<vmem>>, %arg4: memref<2x8x32xf32, #tpu.memory_space<vmem>>, %arg5: memref<2x8x8xf32, #tpu.memory_space<vmem>>) attributes {dimension_semantics = [#tpu.dimension_semantics<arbitrary>], iteration_bounds = array<i64: 1>, scalar_prefetch = 0 : i64, scratch_operands = 0 : i64, tpu.core_type = #tpu.core_type<tc>, window_params = [{pipeline_mode = #tpu.pipeline_mode<synchronous>, transform_indices = @transform_0, window_bounds = array<i64: 2, 8, 32>}, {pipeline_mode = #tpu.pipeline_mode<synchronous>, transform_indices = @transform_1, window_bounds = array<i64: 32, 96>}, {pipeline_mode = #tpu.pipeline_mode<synchronous>, transform_indices = @transform_2, window_bounds = array<i64: 1, 96>}, {pipeline_mode = #tpu.pipeline_mode<synchronous>, transform_indices = @transform_3, window_bounds = array<i64: 2, 8, 32>}, {pipeline_mode = #tpu.pipeline_mode<synchronous>, transform_indices = @transform_4, window_bounds = array<i64: 2, 8, 8>}]} {
    %c0 = arith.constant 0 : index
    %c0_0 = arith.constant 0 : index
    %c0_1 = arith.constant 0 : index
    %0 = vector.load %arg1[%c0, %c0_0, %c0_1] : memref<2x8x32xf32, #tpu.memory_space<vmem>>, vector<2x8x32xf32>
    %1 = vector.shape_cast %0 : vector<2x8x32xf32> to vector<16x32xf32>
    %c0_2 = arith.constant 0 : index
    %c0_3 = arith.constant 0 : index
    %2 = vector.load %arg2[%c0_2, %c0_3] : memref<32x96xf32, #tpu.memory_space<vmem>>, vector<32x96xf32>
    %cst = arith.constant dense<0.000000e+00> : vector<16x96xf32>
    %3 = tpu.matmul %1, %2, %cst {dimension_numbers = #tpu.dot_dimension_numbers<[1], [0], [0], [1], [0, 0, 1, 1], [], []>} : vector<16x32xf32>, vector<32x96xf32>, vector<16x96xf32> -> vector<16x96xf32>
    %c0_4 = arith.constant 0 : index
    %c0_5 = arith.constant 0 : index
    %4 = vector.load %arg3[%c0_4, %c0_5] : memref<1x96xf32, #tpu.memory_space<vmem>>, vector<1x96xf32>
    %5 = vector.broadcast %4 : vector<1x96xf32> to vector<16x96xf32>
    %6 = arith.addf %3, %5 : vector<16x96xf32>
    %7 = vector.shape_cast %6 : vector<16x96xf32> to vector<2x8x96xf32>
    %8 = vector.extract_strided_slice %7 {offsets = [0, 0, 0], sizes = [2, 8, 32], strides = [1, 1, 1]} : vector<2x8x96xf32> to vector<2x8x32xf32>
    %9 = vector.extract_strided_slice %7 {offsets = [0, 0, 32], sizes = [2, 8, 32], strides = [1, 1, 1]} : vector<2x8x96xf32> to vector<2x8x32xf32>
    %10 = vector.extract_strided_slice %7 {offsets = [0, 0, 64], sizes = [2, 8, 32], strides = [1, 1, 1]} : vector<2x8x96xf32> to vector<2x8x32xf32>
    "tpu.trace_start"() <{level = 10 : i32, message = "bsh,bth->bst"}> : () -> ()
    %cst_6 = arith.constant dense<0.000000e+00> : vector<2x8x8xf32>
    %11 = tpu.matmul %8, %9, %cst_6 {dimension_numbers = #tpu.dot_dimension_numbers<[2], [2], [1], [1], [0, 0, 0, 1, 1, 1], [0], [0]>} : vector<2x8x32xf32>, vector<2x8x32xf32>, vector<2x8x8xf32> -> vector<2x8x8xf32>
    "tpu.trace_stop"() : () -> ()
    %cst_7 = arith.constant 0.000000e+00 : f32
    %12 = vector.broadcast %cst_7 : f32 to vector<2x8x8xf32>
    %13 = arith.maximumf %11, %12 : vector<2x8x8xf32>
    "tpu.trace_start"() <{level = 10 : i32, message = "bsh,bth->bst"}> : () -> ()
    %cst_8 = arith.constant dense<0.000000e+00> : vector<2x8x8xf32>
    %14 = tpu.matmul %9, %8, %cst_8 {dimension_numbers = #tpu.dot_dimension_numbers<[2], [2], [1], [1], [0, 0, 0, 1, 1, 1], [0], [0]>} : vector<2x8x32xf32>, vector<2x8x32xf32>, vector<2x8x8xf32> -> vector<2x8x8xf32>
    "tpu.trace_stop"() : () -> ()
    %cst_9 = arith.constant 0.000000e+00 : f32
    %15 = vector.broadcast %cst_9 : f32 to vector<2x8x8xf32>
    %16 = arith.maximumf %14, %15 : vector<2x8x8xf32>
    %17 = arith.addf %13, %16 : vector<2x8x8xf32>
    %cst_10 = arith.constant 5.000000e-01 : f32
    %18 = vector.broadcast %cst_10 : f32 to vector<2x8x8xf32>
    %19 = arith.mulf %17, %18 : vector<2x8x8xf32>
    %cst_11 = arith.constant dense<0.000000e+00> : vector<2x8xf32>
    %20 = vector.multi_reduction <add>, %19, %cst_11 [2] : vector<2x8x8xf32> to vector<2x8xf32>
    %21 = vector.shape_cast %20 : vector<2x8xf32> to vector<2x8x1xf32>
    %cst_12 = arith.constant 9.99999993E-9 : f32
    %22 = vector.broadcast %cst_12 : f32 to vector<2x8x1xf32>
    %23 = arith.addf %21, %22 : vector<2x8x1xf32>
    %24 = tpu.reciprocal %23 : vector<2x8x1xf32> -> vector<2x8x1xf32>
    %25 = vector.broadcast %24 : vector<2x8x1xf32> to vector<2x8x8xf32>
    %26 = arith.mulf %19, %25 : vector<2x8x8xf32>
    "tpu.trace_start"() <{level = 10 : i32, message = "bst,bth->bsh"}> : () -> ()
    %cst_13 = arith.constant dense<0.000000e+00> : vector<2x8x32xf32>
    %27 = tpu.matmul %26, %10, %cst_13 {dimension_numbers = #tpu.dot_dimension_numbers<[2], [1], [1], [2], [0, 0, 0, 1, 1, 2], [0], [0]>} : vector<2x8x8xf32>, vector<2x8x32xf32>, vector<2x8x32xf32> -> vector<2x8x32xf32>
    "tpu.trace_stop"() : () -> ()
    %28 = arith.addf %27, %0 : vector<2x8x32xf32>
    %c0_14 = arith.constant 0 : index
    %c0_15 = arith.constant 0 : index
    %c0_16 = arith.constant 0 : index
    %29 = vector.load %arg4[%c0_14, %c0_15, %c0_16] : memref<2x8x32xf32, #tpu.memory_space<vmem>>, vector<2x8x32xf32>
    tpu.vector_store %arg4[%c0_14, %c0_15, %c0_16], %28 {strides = array<i32>} : memref<2x8x32xf32, #tpu.memory_space<vmem>>, vector<2x8x32xf32>,
    %c0_17 = arith.constant 0 : index
    %c0_18 = arith.constant 0 : index
    %c0_19 = arith.constant 0 : index
    %30 = vector.load %arg5[%c0_17, %c0_18, %c0_19] : memref<2x8x8xf32, #tpu.memory_space<vmem>>, vector<2x8x8xf32>
    tpu.vector_store %arg5[%c0_17, %c0_18, %c0_19], %26 {strides = array<i32>} : memref<2x8x8xf32, #tpu.memory_space<vmem>>, vector<2x8x8xf32>,
    return
  }
  func.func @transform_0(%arg0: i32) -> (i32, i32, i32) {
    %c0_i32 = arith.constant 0 : i32
    %c0_i32_0 = arith.constant 0 : i32
    %c0_i32_1 = arith.constant 0 : i32
    %c0_i32_2 = arith.constant 0 : i32
    return %c0_i32, %c0_i32_0, %c0_i32_1 : i32, i32, i32
  }
  func.func @transform_1(%arg0: i32) -> (i32, i32) {
    %c0_i32 = arith.constant 0 : i32
    %c0_i32_0 = arith.constant 0 : i32
    %c0_i32_1 = arith.constant 0 : i32
    return %c0_i32, %c0_i32_0 : i32, i32
  }
  func.func @transform_2(%arg0: i32) -> (i32, i32) {
    %c0_i32 = arith.constant 0 : i32
    %c0_i32_0 = arith.constant 0 : i32
    %c0_i32_1 = arith.constant 0 : i32
    return %c0_i32, %c0_i32_0 : i32, i32
  }
  func.func @transform_3(%arg0: i32) -> (i32, i32, i32) {
    %c0_i32 = arith.constant 0 : i32
    %c0_i32_0 = arith.constant 0 : i32
    %c0_i32_1 = arith.constant 0 : i32
    %c0_i32_2 = arith.constant 0 : i32
    return %c0_i32, %c0_i32_0, %c0_i32_1 : i32, i32, i32
  }
  func.func @transform_4(%arg0: i32) -> (i32, i32, i32) {
    %c0_i32 = arith.constant 0 : i32
    %c0_i32_0 = arith.constant 0 : i32
    %c0_i32_1 = arith.constant 0 : i32
    %c0_i32_2 = arith.constant 0 : i32
    return %c0_i32, %c0_i32_0, %c0_i32_1 : i32, i32, i32
  }
}

</mosaic_0001>

<bundles_post_ra>
// kernel: tpu_custom_call.1
= control target key start
LH: loop header
LB: loop body
LE: loop exit
PB: predicated region body
PF: predicated region fallthrough
CT: control target
= control target key end

     0   :  { %10 = vsyncpa [#allocation3], 0  ;;  %s916_s0 = inlined_call_operand.hbm [shape: f32[2,8,32], index: 0, kind: input, shape index: {}]   ;;  %s917_s1 = inlined_call_operand.hbm [shape: f32[32,96], index: 1, kind: input, shape index: {}]   ;;  %s918_s2 = inlined_call_operand.vmem [shape: f32[1,96], index: 2, kind: input, shape index: {}]   ;;  %s919_s3 = inlined_call_operand.hbm [shape: f32[2,8,32], index: 3, kind: output, shape index: {0}]   ;;  %s920_s4 = inlined_call_operand.hbm [shape: f32[2,8,8], index: 4, kind: output, shape index: {1}]  }
   0x1   :  { %11 = vsyncpa [#allocation6], 0 }
   0x2   :  { %12 = vsyncpa [#allocation4], 0 }
   0x3   :  { %13 = vsyncpa [#allocation9], 0  ;;  %s820_s15 = smov [#allocation2]  }
   0x4   :  { %s19_s16 = sshll.u32 %s820_s15, 4  ;;  %s20_s16 = int_to_ptr.vmem [resolvable:$true] %s19_s16 }
   0x5   :  { %s740_s17 = scalar_lea.vmem %s20_s16, 256  ;;  %p745_p1 = scmp.lt.s32.totalorder %s20_s16, %s20_s16 }
   0x6   :  { %p741_p0 = scmp.ne.s32.totalorder %s20_s16, %s740_s17  ;;  %p746_p2 = scmp.lt.s32.totalorder %s740_s17, %s740_s17 }
   0x8   :  { %p747_p3 = por %p746_p2, %p745_p1 }
   0xa   :  { %p748_p4 = pnand %p747_p3, %p741_p0 }
   0xc   :  { %751 = shalt.err (!%p748_p4)
}
   0xd   :  { %s821_s18 = smov 128   ;;  %s822_s19 = smov 8  }
   0xe   :  { %25 = dma.hbm_to_vmem [thread:$0]  %s916_s0, 256, %s20_s16, [#allocation3], %s821_s18, %s821_s18, %s822_s19  }
   0xf   :  { %s823_s22 = smov [#allocation5]  }
  0x10   :  { %s31_s23 = sshll.u32 %s823_s22, 4  ;;  %s32_s23 = int_to_ptr.vmem [resolvable:$true] %s31_s23 }
  0x11   :  { %s760_s24 = scalar_lea.vmem %s32_s23, 512  ;;  %p765_p6 = scmp.lt.s32.totalorder %s32_s23, %s32_s23 }
  0x12   :  { %p761_p5 = scmp.ne.s32.totalorder %s32_s23, %s760_s24  ;;  %p766_p7 = scmp.lt.s32.totalorder %s760_s24, %s760_s24 }
  0x14   :  { %p767_p8 = por %p766_p7, %p765_p6 }
  0x16   :  { %p768_p9 = pnand %p767_p8, %p761_p5 }
  0x18   :  { %771 = shalt.err (!%p768_p9)
}
  0x19   :  { %37 = dma.hbm_to_vmem [thread:$0]  %s917_s1, 512, %s32_s23, [#allocation6], %s821_s18, %s821_s18, %s822_s19  }
  0x1a   :  { %812 = dma.done.wait [#allocation3], 256  }
  0x1b   :  { %813 = vsyncadd [#allocation3], 4294967040 }
  0x1c   :  { %814 = dma.done.wait [#allocation6], 512  }
  0x1d   :  { %815 = vsyncadd [#allocation6], 4294966784  ;;  %vm59_vm0 = vcmask 261120   ;;  %v51_v0 = vld [vmem:[#allocation5 + $0x18] sm:$0xff]  ;;  %v50_v1 = vld [vmem:[#allocation5 + $0x10] sm:$0xff]  ;;  %v824_v6 = vmov 0.0  }
  0x1e   :  { %677 = vmatprep.subr.mxu0 %v51_v0  ;;  %v867_v2 = vld [vmem:[#allocation2] sm:$0xff]  ;;  %v49_v3 = vld [vmem:[#allocation5 + $0x8] sm:$0xff]  ;;  %v48_v4 = vld [vmem:[#allocation5] sm:$0xff]  ;;  %688 = vmatprep.subr.mxu1 %v824_v6  ;;  %vm825_vm1 = vmmov 0   ;;  %s826_s27 = smov 96   ;;  %s827_s28 = smov 64  }
  0x1f   :  { %678 = vmatpush3.msra.mxu0 %v51_v0  ;;  %685 = vmatprep.mubr.msk.f32.mxu0 %vm59_vm0, %v867_v2  ;;  %v871_v5 = vld [vmem:[#allocation2 + $0x8] sm:$0xff]  ;;  %v646_v8 = vld [vmem:[%s918_s2] ss:$0 sm:$0xff]  ;;  %vm443_vm2 = vcmask 64512   ;;  %s828_s2 = smov [#allocation8]  }
  0x20   :  { %679 = vmatprep.subr.mxu0 %v50_v1  ;;  %690 = vmatprep.mubr.msk.f32.mxu1 %vm825_vm1, %v824_v6  ;;  %s629_s29 = sshll.u32 %s828_s2, 4  ;;  %s630_s29 = int_to_ptr.vmem [resolvable:$true] %s629_s29 }
  0x21   :  { %680 = vmatpush3.msra.mxu0 %v50_v1  ;;  %s772_s30 = scalar_lea.vmem %s630_s29, 256  ;;  %p777_p11 = scmp.lt.s32.totalorder %s630_s29, %s630_s29 }
  0x22   :  { %681 = vmatprep.subr.mxu0 %v49_v3  ;;  %p773_p10 = scmp.ne.s32.totalorder %s630_s29, %s772_s30  ;;  %p778_p12 = scmp.lt.s32.totalorder %s772_s30, %s772_s30 }
  0x23   :  { %682 = vmatpush3.msra.mxu0 %v49_v3 }
  0x24   :  { %683 = vmatprep.subr.mxu0 %v48_v4  ;;  %p779_p13 = por %p778_p12, %p777_p11 }
  0x25   :  { %684 = vmatpush3.msra.mxu0 %v48_v4 }
  0x26   :  { %686 = vmatmul.mubr.msk.f32.vlgmr.msra.gmra.mxu0 %vm59_vm0, %v871_v5  ;;  %698 = vmatprep.subr.mxu0 %v824_v6  ;;  %p780_p0 = pnand %p779_p13, %p773_p10 }
  0x27   :  { %700 = vmatprep.mubr.msk.f32.mxu0 %vm825_vm1, %v824_v6 }
  0xe6   :  { %v687_v7 = vpop.f32.mrf.mxu0 }
  0xe7   :  { %v138_v11 = vadd.f32 %v687_v7, %v646_v8 }
  0xe8   :  { %v132_v9 = vpop.f32.mrf.mxu0 }
  0xe9   :  { %v133_v10 = vadd.f32 %v646_v8, %v132_v9 }
  0xeb   :  { %142 = vrot.lane.b32.xlu0 %v133_v10, %s826_s27  ;;  %699 = vmatpush3.xpose.msk.msra.mxu0 %vm59_vm0, %v133_v10 }
  0xec   :  { %708 = vmatprep.subr.mxu0 %v824_v6 }
  0xef   :  { %219 = vrot.lane.b32.xlu0 %v138_v11, %s826_s27 }
  0xf3   :  { %456 = vrot.lane.b32.xlu0 %v133_v10, %s827_s28 }
 0x15d   :  { %v143_v12 = vpop.permute.xlu0 %142 }
 0x15e   :  { %689 = vmatpush3.xpose.msk.msra.mxu1 %vm59_vm0, %v143_v12  ;;  %701 = vmatmul.mubr.msk.f32.vlgmr.msra.gmra.mxu0 %vm59_vm0, %v143_v12 }
 0x15f   :  { %693 = vmatprep.subr.mxu1 %v824_v6  ;;  %710 = vmatprep.mubr.msk.f32.mxu0 %vm825_vm1, %v824_v6 }
 0x161   :  { %691 = vmatmul.mubr.msk.f32.vlgmr.msra.gmra.mxu1 %vm59_vm0, %v133_v10  ;;  %v220_v13 = vpop.permute.xlu0 %219 }
 0x162   :  { %694 = vmatpush3.xpose.msk.msra.mxu1 %vm59_vm0, %v220_v13  ;;  %695 = vmatprep.mubr.msk.f32.mxu1 %vm825_vm1, %v824_v6 }
 0x163   :  { %703 = vmatprep.subr.mxu1 %v824_v6 }
 0x165   :  { %696 = vmatmul.mubr.msk.f32.vlgmr.msra.gmra.mxu1 %vm59_vm0, %v138_v11  ;;  %v457_v14 = vpop.permute.xlu0 %456 }
 0x166   :  { %704 = vmatpush3.xpose.msk.msra.mxu1 %vm59_vm0, %v138_v11  ;;  %709 = vmatpush3.msra.mxu0 %v457_v14 }
 0x167   :  { %705 = vmatprep.mubr.msk.f32.mxu1 %vm825_vm1, %v824_v6  ;;  %713 = vmatprep.subr.mxu1 %v824_v6 }
 0x169   :  { %706 = vmatmul.mubr.msk.f32.vlgmr.msra.gmra.mxu1 %vm59_vm0, %v220_v13 }
 0x16a   :  { %715 = vmatprep.mubr.msk.f32.mxu1 %vm825_vm1, %v824_v6 }
 0x21e   :  { %v363_v15 = vpop.f32.mrf.mxu0 }
 0x21f   :  { %v437_v18 = vmax.f32 %v363_v15, 0.0 }
 0x220   :  { %v702_v16 = vpop.f32.mrf.mxu0 }
 0x221   :  { %v214_v17 = vpop.f32.mrf.mxu1 }
 0x222   :  { %v295_v19 = vmax.f32 %v214_v17, 0.0 }
 0x223   :  { %v692_v20 = vpop.f32.mrf.mxu1 }
 0x224   :  { %v439_v21 = vadd.f32 %v437_v18, %v295_v19 }
 0x225   :  { %v291_v22 = vpop.f32.mrf.mxu1 }
 0x226   :  { %v441_v23 = vmul.f32 0.5, %v439_v21  ;;  %v296_v27 = vmax.f32 %v291_v22, 0.0 }
 0x227   :  { %v697_v24 = vpop.f32.mrf.mxu1 }
 0x228   :  { %v444_v25 = vsel %vm443_vm2, %v441_v23, 0.0 }
 0x229   :  { %v433_v26 = vpop.f32.mrf.mxu1  ;;  %445 = vadd.xlane.f32.xlu1 %v444_v25 }
 0x22a   :  { %v438_v28 = vmax.f32 %v433_v26, 0.0 }
 0x22b   :  { %v707_v29 = vpop.f32.mrf.mxu1 }
 0x22c   :  { %v440_v30 = vadd.f32 %v438_v28, %v296_v27 }
 0x22e   :  { %v442_v31 = vmul.f32 0.5, %v440_v30 }
 0x230   :  { %v447_v32 = vsel %vm443_vm2, %v442_v31, 0.0 }
 0x231   :  { %448 = vadd.xlane.f32.xlu1 %v447_v32 }
 0x242   :  { %532 = vrot.lane.b32.xlu1 %v138_v11, %s827_s28 }
 0x2b2   :  { %v446_v33 = vpop.xlane.xlu1 %445 }
 0x2b3   :  { %v450_v34 = vadd.f32 1e-08, %v446_v33 }
 0x2b5   :  { %728 = vrcp.f32 %v450_v34 }
 0x2ba   :  { %v449_v35 = vpop.xlane.xlu1 %448 }
 0x2bb   :  { %v451_v36 = vadd.f32 1e-08, %v449_v35 }
 0x2bd   :  { %730 = vrcp.f32 %v451_v36 }
 0x2be   :  { %v533_v37 = vpop.permute.xlu1 %532 }
 0x2bf   :  { %714 = vmatpush3.msra.mxu1 %v533_v37 }
 0x2c2   :  { %v729_v38 = vpop.eup %728 }
 0x2c3   :  { %v454_v39 = vmul.f32 %v729_v38, %v441_v23 }
 0x2c5   :  { %711 = vmatmul.mubr.msk.f32.vlgmr.msra.gmra.mxu0 %vm443_vm2, %v454_v39  ;;  %610 = vst.msk [vmem:[#allocation8] sm:$0xff] %vm443_vm2, %v454_v39 }
 0x2ca   :  { %v731_v40 = vpop.eup %730 }
 0x2cb   :  { %v455_v41 = vmul.f32 %v731_v40, %v442_v31 }
 0x2cd   :  { %716 = vmatmul.mubr.msk.f32.vlgmr.msra.gmra.mxu1 %vm443_vm2, %v455_v41  ;;  %611 = vst.msk [vmem:[#allocation8 + $0x8] sm:$0xff] %vm443_vm2, %v455_v41 }
 0x2ce   :  { %783 = shalt.err (!%p780_p0)
}
 0x2cf   :  { %635 = dma.vmem_to_hbm [thread:$0]  %s630_s29, 256, %s920_s4, [#allocation9], %s821_s18, %s821_s18, %s822_s19  }
 0x2d0   :  { %s829_s7 = smov [#allocation7]  }
 0x2d1   :  { %s617_s8 = sshll.u32 %s829_s7, 4  ;;  %s618_s8 = int_to_ptr.vmem [resolvable:$true] %s617_s8 }
 0x2d2   :  { %s792_s9 = scalar_lea.vmem %s618_s8, 256  ;;  %p797_p2 = scmp.lt.s32.totalorder %s618_s8, %s618_s8 }
 0x2d3   :  { %p793_p1 = scmp.ne.s32.totalorder %s618_s8, %s792_s9  ;;  %p798_p3 = scmp.lt.s32.totalorder %s792_s9, %s792_s9 }
 0x2d5   :  { %p799_p4 = por %p798_p3, %p797_p2 }
 0x2d7   :  { %p800_p5 = pnand %p799_p4, %p793_p1 }
 0x385   :  { %v528_v42 = vpop.f32.mrf.mxu0 }
 0x386   :  { %v529_v43 = vadd.f32 %v528_v42, %v867_v2 }
 0x387   :  { %v712_v44 = vpop.f32.mrf.mxu0 }
 0x388   :  { %608 = vst.msk [vmem:[#allocation7] sm:$0xff] %vm59_vm0, %v529_v43 }
 0x38d   :  { %v604_v45 = vpop.f32.mrf.mxu1 }
 0x38e   :  { %v605_v46 = vadd.f32 %v604_v45, %v871_v5 }
 0x38f   :  { %v717_v47 = vpop.f32.mrf.mxu1 }
 0x390   :  { %609 = vst.msk [vmem:[#allocation7 + $0x8] sm:$0xff] %vm59_vm0, %v605_v46 }
 0x391   :  { %803 = shalt.err (!%p800_p5)
}
 0x392   :  { %623 = dma.vmem_to_hbm [thread:$0]  %s618_s8, 256, %s919_s3, [#allocation4], %s821_s18, %s821_s18, %s822_s19  }
 0x393   :  { %816 = dma.done.wait [#allocation4], 256  }
 0x394   :  { %817 = vsyncadd [#allocation4], 4294967040 }
 0x395   :  { %818 = dma.done.wait [#allocation9], 256  }
 0x396   :  { %819 = vsyncadd [#allocation9], 4294967040 }
 0x397   :  { %642 = vsyncpa [#allocation3], 1 }
 0x398   :  { %643 = vsyncpa [#allocation6], 1 }
 0x399   :  { %644 = vsyncpa [#allocation4], 1 }
 0x39a   :  { %645 = vsyncpa [#allocation9], 1 }

</bundles_post_ra>
